<compile_context>
chip_gen: v7x
topology: tpu7x:2x2x1
jax: 0.10.0
libtpu: 0.0.40
codegen_flags: <defaults>
</compile_context>

<pallas_src>
import functools

import jax
import jax.numpy as jnp
from jax.experimental import pallas as pl
from jax.experimental.pallas import tpu as pltpu

LANE = 128
ROW_ALIGN = 16  # bf16 output tiles: sublane-packed rows travel in pairs -> 16-align


def _round_up(x, m):
    return ((x + m - 1) // m) * m


def actor_kernel(x_ref, w1_ref, b1_ref, w2_ref, b2_ref, w3_ref, b3_ref, o_ref):
    # MXU matmuls in bf16 with f32 accumulation; bias-add / ReLU in f32.
    x = x_ref[...].astype(jnp.bfloat16)
    h1 = jnp.dot(x, w1_ref[...], preferred_element_type=jnp.float32) + b1_ref[...]
    h1 = jnp.maximum(h1, 0.0).astype(jnp.bfloat16)
    h2 = jnp.dot(h1, w2_ref[...], preferred_element_type=jnp.float32) + b2_ref[...]
    h2 = jnp.maximum(h2, 0.0).astype(jnp.bfloat16)
    o_ref[...] = (
        jnp.dot(h2, w3_ref[...], preferred_element_type=jnp.float32) + b3_ref[...]
    ).astype(o_ref.dtype)


def _pick_tile_m(B):
    """Batch tiling: 1 step for small B, an even number of large steps otherwise."""
    if B <= 256:
        return _round_up(B, ROW_ALIGN)          # single grid step
    n_steps = 2 * pl.cdiv(B, 1024)              # even step count (v7x 2-TC split)
    return _round_up(pl.cdiv(B, n_steps), ROW_ALIGN)


@functools.partial(jax.jit, static_argnames=("n_actions",))
def actor_forward(state, params, n_actions):
    """state: [B, ip_dims] float32. params: dict with bf16 weights (stored [in,out])
    and f32 biases; the final layer is zero-padded to a multiple-of-128 width."""
    w1, b1 = params["w1"], params["b1"]
    w2, b2 = params["w2"], params["b2"]
    w3, b3 = params["w3"], params["b3"]

    B, ip_dims = state.shape
    n_pad = w3.shape[1]  # lane-dense padded action width (multiple of 128)

    tile_m = _pick_tile_m(B)
    grid_m = pl.cdiv(B, tile_m)
    out_rows = grid_m * tile_m  # output rows divide evenly; input tail tile is ragged

    # Weights/biases: full-extent blocks with constant index_maps -> fetched once
    # and kept resident in VMEM across all batch tiles.
    resident = lambda shape: pl.BlockSpec(shape, lambda i: (0,) * len(shape))

    out = pl.pallas_call(
        actor_kernel,
        out_shape=jax.ShapeDtypeStruct((out_rows, n_pad), jnp.bfloat16),
        grid=(grid_m,),
        in_specs=[
            pl.BlockSpec((tile_m, ip_dims), lambda i: (i, 0)),  # stream x tiles
            resident(w1.shape), resident(b1.shape),
            resident(w2.shape), resident(b2.shape),
            resident(w3.shape), resident(b3.shape),
        ],
        out_specs=pl.BlockSpec((tile_m, n_pad), lambda i: (i, 0)),
        compiler_params=pltpu.CompilerParams(
            dimension_semantics=("parallel",),  # megacore-shard batch tiles on v7x
        ),
    )(state, w1, b1, w2, b2, w3, b3)

    # Tiny slice + cast back to f32 to match the PyTorch forward() contract.
    return out[:B, :n_actions].astype(jnp.float32)


def init_actor_params(key, ip_dims, n_actions, hl_1_dims=256, hl_2_dims=256):
    """Mimics PyTorch nn.Linear default init U(-1/sqrt(fan_in), 1/sqrt(fan_in)).
    Weights stored transposed [in, out] and cast to bf16; the final layer is
    zero-padded on the output dim to the next multiple of 128."""
    keys = jax.random.split(key, 6)

    def linear(kw, kb, fan_in, fan_out):
        bound = 1.0 / jnp.sqrt(jnp.float32(fan_in))
        w = jax.random.uniform(kw, (fan_in, fan_out), jnp.float32, -bound, bound)
        b = jax.random.uniform(kb, (1, fan_out), jnp.float32, -bound, bound)
        return w, b

    w1, b1 = linear(keys[0], keys[1], ip_dims, hl_1_dims)
    w2, b2 = linear(keys[2], keys[3], hl_1_dims, hl_2_dims)
    w3, b3 = linear(keys[4], keys[5], hl_2_dims, n_actions)

    n_pad = _round_up(n_actions, LANE)
    w3 = jnp.pad(w3, ((0, 0), (0, n_pad - n_actions)))
    b3 = jnp.pad(b3, ((0, 0), (0, n_pad - n_actions)))

    return {
        "w1": w1.astype(jnp.bfloat16), "b1": b1,
        "w2": w2.astype(jnp.bfloat16), "b2": b2,
        "w3": w3.astype(jnp.bfloat16), "b3": b3,
    }


def actor_forward_ref(state, params, n_actions):
    """Pure-JAX reference with the same bf16/f32 precision policy as the kernel
    (including the bf16 output store)."""
    x = state.astype(jnp.bfloat16)
    h1 = jnp.maximum(
        jnp.dot(x, params["w1"], preferred_element_type=jnp.float32) + params["b1"], 0.0
    ).astype(jnp.bfloat16)
    h2 = jnp.maximum(
        jnp.dot(h1, params["w2"], preferred_element_type=jnp.float32) + params["b2"], 0.0
    ).astype(jnp.bfloat16)
    out = jnp.dot(h2, params["w3"], preferred_element_type=jnp.float32) + params["b3"]
    return out[:, :n_actions].astype(jnp.bfloat16).astype(jnp.float32)


if __name__ == "__main__":
    key = jax.random.PRNGKey(0)
    k_param, k_state, k_state2 = jax.random.split(key, 3)

    ip_dims = 16
    n_actions = 4
    params = init_actor_params(k_param, ip_dims, n_actions,
                               hl_1_dims=256, hl_2_dims=256)

    # Small batch: single grid step; the 16-row block over 8 valid rows exercises
    # the partial-block read path (tail rows are discarded by the slice).
    batch = 8
    state = jax.random.normal(k_state, (batch, ip_dims), jnp.float32)
    out = jax.block_until_ready(actor_forward(state, params, n_actions))
    ref = actor_forward_ref(state, params, n_actions)
    assert out.shape == (batch, n_actions)
    assert out.dtype == jnp.float32
    assert jnp.allclose(out, ref, atol=1e-2, rtol=1e-2), "mismatch vs reference (B=8)"

    # Larger batch: 2 even grid steps (tile_m=160) with a ragged last input tile
    # (rows 160..299 valid, 300..319 masked/discarded) — no wrapper-side padding.
    batch2 = 300
    state2 = jax.random.normal(k_state2, (batch2, ip_dims), jnp.float32)
    out2 = jax.block_until_ready(actor_forward(state2, params, n_actions))
    ref2 = actor_forward_ref(state2, params, n_actions)
    assert out2.shape == (batch2, n_actions)
    assert jnp.allclose(out2, ref2, atol=1e-2, rtol=1e-2), "mismatch vs reference (B=300)"

    # TODO(synk): the Adam optimizer / training step from the PyTorch module is not
    # part of the forward pass and is not implemented here.
    print("KERNEL_OK")
</pallas_src>

<mosaic_0001>
module attributes {stable_mosaic.version = 11 : i64} {
  func.func @actor_kernel(%arg0: i32, %arg1: memref<16x16xf32, #tpu.memory_space<vmem>>, %arg2: memref<16x256xbf16, #tpu.memory_space<vmem>>, %arg3: memref<1x256xf32, #tpu.memory_space<vmem>>, %arg4: memref<256x256xbf16, #tpu.memory_space<vmem>>, %arg5: memref<1x256xf32, #tpu.memory_space<vmem>>, %arg6: memref<256x128xbf16, #tpu.memory_space<vmem>>, %arg7: memref<1x128xf32, #tpu.memory_space<vmem>>, %arg8: memref<16x128xbf16, #tpu.memory_space<vmem>>) attributes {dimension_semantics = [#tpu.dimension_semantics<parallel>], iteration_bounds = array<i64: 1>, scalar_prefetch = 0 : i64, scratch_operands = 0 : i64, tpu.core_type = #tpu.core_type<tc>, window_params = [{transform_indices = @transform_0, window_bounds = array<i64: 16, 16>}, {pipeline_mode = #tpu.pipeline_mode<synchronous>, transform_indices = @transform_1, window_bounds = array<i64: 16, 256>}, {pipeline_mode = #tpu.pipeline_mode<synchronous>, transform_indices = @transform_2, window_bounds = array<i64: 1, 256>}, {pipeline_mode = #tpu.pipeline_mode<synchronous>, transform_indices = @transform_3, window_bounds = array<i64: 256, 256>}, {pipeline_mode = #tpu.pipeline_mode<synchronous>, transform_indices = @transform_4, window_bounds = array<i64: 1, 256>}, {pipeline_mode = #tpu.pipeline_mode<synchronous>, transform_indices = @transform_5, window_bounds = array<i64: 256, 128>}, {pipeline_mode = #tpu.pipeline_mode<synchronous>, transform_indices = @transform_6, window_bounds = array<i64: 1, 128>}, {transform_indices = @transform_7, window_bounds = array<i64: 16, 128>}]} {
    %c0 = arith.constant 0 : index
    %c0_0 = arith.constant 0 : index
    %0 = vector.load %arg1[%c0, %c0_0] : memref<16x16xf32, #tpu.memory_space<vmem>>, vector<16x16xf32>
    %1 = arith.truncf %0 : vector<16x16xf32> to vector<16x16xbf16>
    %c0_1 = arith.constant 0 : index
    %c0_2 = arith.constant 0 : index
    %2 = vector.load %arg2[%c0_1, %c0_2] : memref<16x256xbf16, #tpu.memory_space<vmem>>, vector<16x256xbf16>
    %cst = arith.constant dense<0.000000e+00> : vector<16x256xf32>
    %3 = tpu.matmul %1, %2, %cst {dimension_numbers = #tpu.dot_dimension_numbers<[1], [0], [0], [1], [0, 0, 1, 1], [], []>} : vector<16x16xbf16>, vector<16x256xbf16>, vector<16x256xf32> -> vector<16x256xf32>
    %c0_3 = arith.constant 0 : index
    %c0_4 = arith.constant 0 : index
    %4 = vector.load %arg3[%c0_3, %c0_4] : memref<1x256xf32, #tpu.memory_space<vmem>>, vector<1x256xf32>
    %5 = vector.broadcast %4 : vector<1x256xf32> to vector<16x256xf32>
    %6 = arith.addf %3, %5 : vector<16x256xf32>
    %cst_5 = arith.constant 0.000000e+00 : f32
    %7 = vector.broadcast %cst_5 : f32 to vector<16x256xf32>
    %8 = arith.maximumf %6, %7 : vector<16x256xf32>
    %9 = arith.truncf %8 : vector<16x256xf32> to vector<16x256xbf16>
    %c0_6 = arith.constant 0 : index
    %c0_7 = arith.constant 0 : index
    %10 = vector.load %arg4[%c0_6, %c0_7] : memref<256x256xbf16, #tpu.memory_space<vmem>>, vector<256x256xbf16>
    %cst_8 = arith.constant dense<0.000000e+00> : vector<16x256xf32>
    %11 = tpu.matmul %9, %10, %cst_8 {dimension_numbers = #tpu.dot_dimension_numbers<[1], [0], [0], [1], [0, 0, 1, 1], [], []>} : vector<16x256xbf16>, vector<256x256xbf16>, vector<16x256xf32> -> vector<16x256xf32>
    %c0_9 = arith.constant 0 : index
    %c0_10 = arith.constant 0 : index
    %12 = vector.load %arg5[%c0_9, %c0_10] : memref<1x256xf32, #tpu.memory_space<vmem>>, vector<1x256xf32>
    %13 = vector.broadcast %12 : vector<1x256xf32> to vector<16x256xf32>
    %14 = arith.addf %11, %13 : vector<16x256xf32>
    %cst_11 = arith.constant 0.000000e+00 : f32
    %15 = vector.broadcast %cst_11 : f32 to vector<16x256xf32>
    %16 = arith.maximumf %14, %15 : vector<16x256xf32>
    %17 = arith.truncf %16 : vector<16x256xf32> to vector<16x256xbf16>
    %c0_12 = arith.constant 0 : index
    %c0_13 = arith.constant 0 : index
    %18 = vector.load %arg6[%c0_12, %c0_13] : memref<256x128xbf16, #tpu.memory_space<vmem>>, vector<256x128xbf16>
    %cst_14 = arith.constant dense<0.000000e+00> : vector<16x128xf32>
    %19 = tpu.matmul %17, %18, %cst_14 {dimension_numbers = #tpu.dot_dimension_numbers<[1], [0], [0], [1], [0, 0, 1, 1], [], []>} : vector<16x256xbf16>, vector<256x128xbf16>, vector<16x128xf32> -> vector<16x128xf32>
    %c0_15 = arith.constant 0 : index
    %c0_16 = arith.constant 0 : index
    %20 = vector.load %arg7[%c0_15, %c0_16] : memref<1x128xf32, #tpu.memory_space<vmem>>, vector<1x128xf32>
    %21 = vector.broadcast %20 : vector<1x128xf32> to vector<16x128xf32>
    %22 = arith.addf %19, %21 : vector<16x128xf32>
    %23 = arith.truncf %22 : vector<16x128xf32> to vector<16x128xbf16>
    %c0_17 = arith.constant 0 : index
    %c0_18 = arith.constant 0 : index
    %24 = vector.load %arg8[%c0_17, %c0_18] : memref<16x128xbf16, #tpu.memory_space<vmem>>, vector<16x128xbf16>
    tpu.vector_store %arg8[%c0_17, %c0_18], %23 {strides = array<i32>} : memref<16x128xbf16, #tpu.memory_space<vmem>>, vector<16x128xbf16>,
    return
  }
  func.func @transform_0(%arg0: i32) -> (i32, i32) {
    %c0_i32 = arith.constant 0 : i32
    %c0_i32_0 = arith.constant 0 : i32
    return %arg0, %c0_i32 : i32, i32
  }
  func.func @transform_1(%arg0: i32) -> (i32, i32) {
    %c0_i32 = arith.constant 0 : i32
    %c0_i32_0 = arith.constant 0 : i32
    %c0_i32_1 = arith.constant 0 : i32
    return %c0_i32, %c0_i32_0 : i32, i32
  }
  func.func @transform_2(%arg0: i32) -> (i32, i32) {
    %c0_i32 = arith.constant 0 : i32
    %c0_i32_0 = arith.constant 0 : i32
    %c0_i32_1 = arith.constant 0 : i32
    return %c0_i32, %c0_i32_0 : i32, i32
  }
  func.func @transform_3(%arg0: i32) -> (i32, i32) {
    %c0_i32 = arith.constant 0 : i32
    %c0_i32_0 = arith.constant 0 : i32
    %c0_i32_1 = arith.constant 0 : i32
    return %c0_i32, %c0_i32_0 : i32, i32
  }
  func.func @transform_4(%arg0: i32) -> (i32, i32) {
    %c0_i32 = arith.constant 0 : i32
    %c0_i32_0 = arith.constant 0 : i32
    %c0_i32_1 = arith.constant 0 : i32
    return %c0_i32, %c0_i32_0 : i32, i32
  }
  func.func @transform_5(%arg0: i32) -> (i32, i32) {
    %c0_i32 = arith.constant 0 : i32
    %c0_i32_0 = arith.constant 0 : i32
    %c0_i32_1 = arith.constant 0 : i32
    return %c0_i32, %c0_i32_0 : i32, i32
  }
  func.func @transform_6(%arg0: i32) -> (i32, i32) {
    %c0_i32 = arith.constant 0 : i32
    %c0_i32_0 = arith.constant 0 : i32
    %c0_i32_1 = arith.constant 0 : i32
    return %c0_i32, %c0_i32_0 : i32, i32
  }
  func.func @transform_7(%arg0: i32) -> (i32, i32) {
    %c0_i32 = arith.constant 0 : i32
    %c0_i32_0 = arith.constant 0 : i32
    return %arg0, %c0_i32 : i32, i32
  }
}

</mosaic_0001>

<bundles_post_ra>
// kernel: actor_forward.1
= control target key start
LH: loop header
LB: loop body
LE: loop exit
PB: predicated region body
PF: predicated region fallthrough
CT: control target
= control target key end

     0   :  { %12 = vsyncpa [#allocation3], 0  ;;  %s994_s0 = inlined_call_operand.hbm [shape: f32[8,16], index: 0, kind: input, shape index: {}]   ;;  %s995_s1 = inlined_call_operand.hbm [shape: bf16[16,256], index: 1, kind: input, shape index: {}]   ;;  %s996_s2 = inlined_call_operand.vmem [shape: f32[1,256], index: 2, kind: input, shape index: {}]   ;;  %s997_s3 = inlined_call_operand.hbm [shape: bf16[256,256], index: 3, kind: input, shape index: {}]   ;;  %s998_s4 = inlined_call_operand.vmem [shape: f32[1,256], index: 4, kind: input, shape index: {}]   ;;  %s999_s5 = inlined_call_operand.hbm [shape: bf16[256,128], index: 5, kind: input, shape index: {}]   ;;  %s1000_s6 = inlined_call_operand.vmem [shape: f32[1,128], index: 6, kind: input, shape index: {}]   ;;  %s1001_s7 = inlined_call_operand.vmem [shape: bf16[16,128], index: 7, kind: output, shape index: {}]  }
   0x1   :  { %13 = vsyncpa [#allocation5], 0 }
   0x2   :  { %14 = vsyncpa [#allocation8], 0 }
   0x3   :  { %19 = vsyncadd [#allocation3], 128  ;;  %s861_s24 = smov [#allocation4]   ;;  %s862_s26 = smov [#allocation2]  }
   0x4   :  { %s32_s25 = sshll.u32 %s861_s24, 4  ;;  %s20_s27 = sshll.u32 %s862_s26, 4  ;;  %s33_s25 = int_to_ptr.vmem [resolvable:$true] %s32_s25  ;;  %s910_s27 = int_to_ptr.vmem [resolvable:$true] %s20_s27 }
   0x5   :  { %s767_s30 = scalar_lea.hbm %s995_s1, 256 }
   0x6   :  { %p768_p0 = scmp.ne.s32.totalorder %s995_s1, %s767_s30  ;;  %p771_p1 = scmp.lt.u32.totalorder %s767_s30, %s995_s1 }
   0x8   :  { %p773_p2 = pnand %p771_p1, %p768_p0 }
   0xa   :  { %776 = shalt.err (!%p773_p2)
}
   0xb   :  { %s777_s12 = scalar_lea.vmem %s33_s25, 256  ;;  %p782_p4 = scmp.lt.s32.totalorder %s33_s25, %s33_s25 }
   0xc   :  { %p778_p3 = scmp.ne.s32.totalorder %s33_s25, %s777_s12  ;;  %p783_p5 = scmp.lt.s32.totalorder %s777_s12, %s777_s12 }
   0xe   :  { %p784_p6 = por %p783_p5, %p782_p4 }
  0x10   :  { %p785_p7 = pnand %p784_p6, %p778_p3 }
  0x12   :  { %788 = shalt.err (!%p785_p7)
}
  0x13   :  { %s863_s13 = smov 128   ;;  %s864_s14 = smov 8  }
  0x14   :  { %38 = dma.hbm_to_vmem [thread:$0]  %s995_s1, 256, %s33_s25, [#allocation5], %s863_s13, %s863_s13, %s864_s14  }
  0x15   :  { %s789_s19 = scalar_lea.hbm %s994_s0, 128 }
  0x16   :  { %p790_p8 = scmp.ne.s32.totalorder %s994_s0, %s789_s19  ;;  %p793_p9 = scmp.lt.u32.totalorder %s789_s19, %s994_s0 }
  0x18   :  { %p795_p10 = pnand %p793_p9, %p790_p8 }
  0x1a   :  { %798 = shalt.err (!%p795_p10)
}
  0x1b   :  { %s799_s24 = scalar_lea.vmem %s910_s27, 128  ;;  %s803_s1 = scalar_lea.vmem %s910_s27, 256 }
  0x1c   :  { %p800_p11 = scmp.ne.s32.totalorder %s910_s27, %s799_s24  ;;  %p804_p12 = scmp.lt.s32.totalorder %s910_s27, %s910_s27 }
  0x1d   :  { %p805_p13 = scmp.lt.s32.totalorder %s803_s1, %s799_s24 }
  0x1f   :  { %p806_p0 = por %p805_p13, %p804_p12 }
  0x21   :  { %p807_p1 = pnand %p806_p0, %p800_p11 }
  0x23   :  { %810 = shalt.err (!%p807_p1)
}
  0x24   :  { %26 = dma.hbm_to_vmem [thread:$0]  %s994_s0, 128, %s910_s27, [#allocation3], %s863_s13, %s863_s13, %s864_s14  }
  0x25   :  { %s865_s28 = smov [#allocation6]   ;;  %s866_s30 = smov [#allocation7]  }
  0x26   :  { %s46_s29 = sshll.u32 %s865_s28, 4  ;;  %s60_s8 = sshll.u32 %s866_s30, 4  ;;  %s47_s29 = int_to_ptr.vmem [resolvable:$true] %s46_s29  ;;  %s948_s8 = int_to_ptr.vmem [resolvable:$true] %s60_s8 }
  0x27   :  { %s811_s11 = scalar_lea.hbm %s997_s3, 4096 }
  0x28   :  { %p812_p2 = scmp.ne.s32.totalorder %s997_s3, %s811_s11  ;;  %p815_p3 = scmp.lt.u32.totalorder %s811_s11, %s997_s3 }
  0x2a   :  { %p817_p4 = pnand %p815_p3, %p812_p2 }
  0x2c   :  { %820 = shalt.err (!%p817_p4)
}
  0x2d   :  { %s821_s0 = scalar_lea.vmem %s47_s29, 4096  ;;  %p826_p6 = scmp.lt.s32.totalorder %s47_s29, %s47_s29 }
  0x2e   :  { %p822_p5 = scmp.ne.s32.totalorder %s47_s29, %s821_s0  ;;  %p827_p7 = scmp.lt.s32.totalorder %s821_s0, %s821_s0 }
  0x30   :  { %p828_p8 = por %p827_p7, %p826_p6 }
  0x32   :  { %p829_p9 = pnand %p828_p8, %p822_p5 }
  0x34   :  { %832 = shalt.err (!%p829_p9)
}
  0x35   :  { %52 = dma.hbm_to_vmem [thread:$0]  %s997_s3, 4096, %s47_s29, [#allocation5], %s863_s13, %s863_s13, %s864_s14  }
  0x36   :  { %s833_s21 = scalar_lea.hbm %s999_s5, 2048 }
  0x37   :  { %p834_p10 = scmp.ne.s32.totalorder %s999_s5, %s833_s21  ;;  %p837_p11 = scmp.lt.u32.totalorder %s833_s21, %s999_s5 }
  0x39   :  { %p839_p12 = pnand %p837_p11, %p834_p10 }
  0x3b   :  { %842 = shalt.err (!%p839_p12)
}
  0x3c   :  { %s843_s25 = scalar_lea.vmem %s948_s8, 2048  ;;  %p848_p0 = scmp.lt.s32.totalorder %s948_s8, %s948_s8 }
  0x3d   :  { %p844_p13 = scmp.ne.s32.totalorder %s948_s8, %s843_s25  ;;  %p849_p1 = scmp.lt.s32.totalorder %s843_s25, %s843_s25 }
  0x3f   :  { %p850_p2 = por %p849_p1, %p848_p0 }
  0x41   :  { %p851_p3 = pnand %p850_p2, %p844_p13 }
  0x43   :  { %854 = shalt.err (!%p851_p3)
}
  0x44   :  { %s867_s3 = smov 64   ;;  %s868_s13 = smov 4  }
  0x45   :  { %66 = dma.hbm_to_vmem [thread:$0]  %s999_s5, 2048, %s948_s8, [#allocation8], %s867_s3, %s867_s3, %s868_s13  }
  0x46   :  { %855 = dma.done.wait [#allocation3], 256  }
  0x47   :  { %856 = vsyncadd [#allocation3], 4294967040 }
  0x48   :  { %857 = dma.done.wait [#allocation5], 4352  }
  0x49   :  { %858 = vsyncadd [#allocation5], 4294962944 }
  0x4a   :  { %859 = dma.done.wait [#allocation8], 2048  }
  0x4b   :  { %860 = vsyncadd [#allocation8], 4294965248  ;;  %v869_v0 = vmov 0   ;;  %v700_v1 = vld [vmem:[#allocation4 + $0x4] ss:$8 sps:$4 sm:$0xff]   ;;  %v82_v3 = vld [vmem:[#allocation2] sm:$0xff]  ;;  %v89_v49 = vlaneseq }
  0x4c   :  { %145 = vmatprep.mubr.bf16.mxu0 %v869_v0  ;;  %v702_v2 = vld [vmem:[#allocation4] ss:$8 sps:$4 sm:$0xff]   ;;  %v83_v4 = vld [vmem:[#allocation2 + $0x8] sm:$0xff]  ;;  %113 = vmatprep.subr.bf16.mxu0 %v700_v1  ;;  %vm109_vm0 = vcmask 130048   ;;  %v706_v8 = vld [vmem:[#allocation6 + $0x14] ss:$8 sps:$4 sm:$0xff]  }
  0x4d   :  { %v84_v5 = vpack.c.bf16 %v83_v4, %v82_v3  ;;  %v703_v6 = vld [vmem:[#allocation6 + $0x4] ss:$8 sps:$4 sm:$0xff]   ;;  %114 = vmatpush1.bf16.msra.mxu0 %v702_v2  ;;  %v705_v7 = vld [vmem:[#allocation6] ss:$8 sps:$4 sm:$0xff]   ;;  %v708_v9 = vld [vmem:[#allocation6 + $0x10] ss:$8 sps:$4 sm:$0xff]  }
  0x4e   :  { %366 = vmatprep.subr.bf16.mxu1 %v703_v6  ;;  %v709_v10 = vld [vmem:[#allocation6 + $0x24] ss:$8 sps:$4 sm:$0xff]   ;;  %v711_v11 = vld [vmem:[#allocation6 + $0x20] ss:$8 sps:$4 sm:$0xff]   ;;  %v712_v12 = vld [vmem:[#allocation6 + $0x34] ss:$8 sps:$4 sm:$0xff]  }
  0x4f   :  { %367 = vmatpush1.bf16.msra.mxu1 %v705_v7  ;;  %v714_v13 = vld [vmem:[#allocation6 + $0x30] ss:$8 sps:$4 sm:$0xff]   ;;  %v715_v14 = vld [vmem:[#allocation6 + $0x44] ss:$8 sps:$4 sm:$0xff]   ;;  %v717_v15 = vld [vmem:[#allocation6 + $0x40] ss:$8 sps:$4 sm:$0xff]  }
  0x50   :  { %610 = vmatmul.mubr.msk.bf16.vlgmr.msra.gmra.mrb[0].mxu0 %vm109_vm0, %v84_v5  ;;  %368 = vmatprep.subr.bf16.mxu1 %v706_v8  ;;  %v718_v16 = vld [vmem:[#allocation6 + $0x54] ss:$8 sps:$4 sm:$0xff]   ;;  %v720_v17 = vld [vmem:[#allocation6 + $0x50] ss:$8 sps:$4 sm:$0xff]   ;;  %v721_v18 = vld [vmem:[#allocation6 + $0x64] ss:$8 sps:$4 sm:$0xff]  }
  0x51   :  { %v723_v19 = vld [vmem:[#allocation6 + $0x60] ss:$8 sps:$4 sm:$0xff]   ;;  %v724_v20 = vld [vmem:[#allocation6 + $0x74] ss:$8 sps:$4 sm:$0xff]   ;;  %v726_v21 = vld [vmem:[#allocation6 + $0x70] ss:$8 sps:$4 sm:$0xff]  }
  0x52   :  { %v727_v22 = vld [vmem:[#allocation6 + $0x84] ss:$8 sps:$4 sm:$0xff]   ;;  %v729_v23 = vld [vmem:[#allocation6 + $0x80] ss:$8 sps:$4 sm:$0xff]   ;;  %v730_v24 = vld [vmem:[#allocation6 + $0x94] ss:$8 sps:$4 sm:$0xff]  }
  0x53   :  { %369 = vmatpush1.bf16.msra.mxu1 %v708_v9  ;;  %v732_v25 = vld [vmem:[#allocation6 + $0x90] ss:$8 sps:$4 sm:$0xff]   ;;  %v733_v26 = vld [vmem:[#allocation6 + $0xa4] ss:$8 sps:$4 sm:$0xff]   ;;  %v735_v27 = vld [vmem:[#allocation6 + $0xa0] ss:$8 sps:$4 sm:$0xff]  }
  0x54   :  { %370 = vmatprep.subr.bf16.mxu1 %v709_v10  ;;  %v736_v28 = vld [vmem:[#allocation6 + $0xb4] ss:$8 sps:$4 sm:$0xff]   ;;  %v738_v29 = vld [vmem:[#allocation6 + $0xb0] ss:$8 sps:$4 sm:$0xff]   ;;  %v739_v30 = vld [vmem:[#allocation6 + $0xc4] ss:$8 sps:$4 sm:$0xff]  }
  0x55   :  { %v741_v31 = vld [vmem:[#allocation6 + $0xc0] ss:$8 sps:$4 sm:$0xff]   ;;  %v742_v32 = vld [vmem:[#allocation6 + $0xd4] ss:$8 sps:$4 sm:$0xff]   ;;  %v744_v33 = vld [vmem:[#allocation6 + $0xd0] ss:$8 sps:$4 sm:$0xff]  }
  0x56   :  { %v745_v34 = vld [vmem:[#allocation6 + $0xe4] ss:$8 sps:$4 sm:$0xff]   ;;  %v747_v35 = vld [vmem:[#allocation6 + $0xe0] ss:$8 sps:$4 sm:$0xff]   ;;  %v748_v36 = vld [vmem:[#allocation6 + $0xf4] ss:$8 sps:$4 sm:$0xff]  }
  0x57   :  { %371 = vmatpush1.bf16.msra.mxu1 %v711_v11  ;;  %v750_v37 = vld [vmem:[#allocation6 + $0xf0] ss:$8 sps:$4 sm:$0xff]   ;;  %v751_v38 = vld [vmem:[#allocation7 + $0x40] sm:$0xff]   ;;  %v753_v40 = vld [vmem:[#allocation7 + $0x48] sm:$0xff]   ;;  %v90_v50 = vshrl.u32 %v89_v49, 7 }
  0x58   :  { %372 = vmatprep.subr.bf16.mxu1 %v712_v12  ;;  %v752_v39 = vld [vmem:[#allocation7] sm:$0xff]   ;;  %669 = vmatprep.subr.bf16.mxu0 %v751_v38  ;;  %v754_v41 = vld [vmem:[#allocation7 + $0x8] sm:$0xff]   ;;  %v755_v42 = vld [vmem:[#allocation7 + $0x50] sm:$0xff]  }
  0x59   :  { %670 = vmatpush3.bf16.msra.mxu0 %v752_v39  ;;  %v756_v43 = vld [vmem:[#allocation7 + $0x10] sm:$0xff]   ;;  %v757_v44 = vld [vmem:[#allocation7 + $0x58] sm:$0xff]   ;;  %v759_v46 = vld [vmem:[#allocation7 + $0x60] sm:$0xff]   ;;  %v91_v51 = vsub.s32 0, %v90_v50  ;;  %v95_v53 = vsub.s32 1, %v90_v50 }
  0x5a   :  { %671 = vmatprep.subr.bf16.mxu0 %v753_v40  ;;  %v758_v45 = vld [vmem:[#allocation7 + $0x18] sm:$0xff]   ;;  %v760_v47 = vld [vmem:[#allocation7 + $0x20] sm:$0xff]   ;;  %v761_v48 = vld [vmem:[#allocation7 + $0x68] sm:$0xff]  }
  0x5b   :  { %373 = vmatpush1.bf16.msra.mxu1 %v714_v13  ;;  %v87_v52 = vld [vmem:[%s996_s2] sm:$0x3]  ;;  %v762_v6 = vld [vmem:[#allocation7 + $0x28] sm:$0xff]   ;;  %v763_v7 = vld [vmem:[#allocation7 + $0x70] sm:$0xff]  }
  0x5c   :  { %374 = vmatprep.subr.bf16.mxu1 %v715_v14  ;;  %v92_v54 = vrot.slane %v87_v52, %v91_v51  ;;  %v96_v55 = vrot.slane %v87_v52, %v95_v53  ;;  %v764_v8 = vld [vmem:[#allocation7 + $0x30] sm:$0xff]   ;;  %v765_v9 = vld [vmem:[#allocation7 + $0x78] sm:$0xff]   ;;  %v194_v11 = vld [vmem:[%s998_s4] sm:$0x3] }
  0x5d   :  { %672 = vmatpush3.bf16.msra.mxu0 %v754_v41  ;;  %v766_v10 = vld [vmem:[#allocation7 + $0x38] sm:$0xff]   ;;  %v199_v12 = vrot.slane %v194_v11, %v91_v51  ;;  %v203_v13 = vrot.slane %v194_v11, %v95_v53 }
  0x5e   :  { %673 = vmatprep.subr.bf16.mxu0 %v755_v42 }
  0x5f   :  { %375 = vmatpush1.bf16.msra.mxu1 %v717_v15 }
  0x60   :  { %376 = vmatprep.subr.bf16.mxu1 %v718_v16 }
  0x61   :  { %674 = vmatpush3.bf16.msra.mxu0 %v756_v43 }
  0x62   :  { %675 = vmatprep.subr.bf16.mxu0 %v757_v44 }
  0x63   :  { %377 = vmatpush1.bf16.msra.mxu1 %v720_v17 }
  0x64   :  { %378 = vmatprep.subr.bf16.mxu1 %v721_v18 }
  0x65   :  { %676 = vmatpush3.bf16.msra.mxu0 %v758_v45 }
  0x66   :  { %677 = vmatprep.subr.bf16.mxu0 %v759_v46 }
  0x67   :  { %379 = vmatpush1.bf16.msra.mxu1 %v723_v19 }
  0x68   :  { %380 = vmatprep.subr.bf16.mxu1 %v724_v20 }
  0x69   :  { %678 = vmatpush3.bf16.msra.mxu0 %v760_v47 }
  0x6a   :  { %679 = vmatprep.subr.bf16.mxu0 %v761_v48 }
  0x6b   :  { %381 = vmatpush1.bf16.msra.mxu1 %v726_v21 }
  0x6c   :  { %382 = vmatprep.subr.bf16.mxu1 %v727_v22 }
  0x6d   :  { %680 = vmatpush3.bf16.msra.mxu0 %v762_v6 }
  0x6e   :  { %681 = vmatprep.subr.bf16.mxu0 %v763_v7 }
  0x6f   :  { %383 = vmatpush1.bf16.msra.mxu1 %v729_v23 }
  0x70   :  { %384 = vmatprep.subr.bf16.mxu1 %v730_v24 }
  0x71   :  { %682 = vmatpush3.bf16.msra.mxu0 %v764_v8 }
  0x72   :  { %683 = vmatprep.subr.bf16.mxu0 %v765_v9 }
  0x73   :  { %385 = vmatpush1.bf16.msra.mxu1 %v732_v25 }
  0x74   :  { %386 = vmatprep.subr.bf16.mxu1 %v733_v26 }
  0x75   :  { %684 = vmatpush3.bf16.msra.mxu0 %v766_v10 }
  0x77   :  { %387 = vmatpush1.bf16.msra.mxu1 %v735_v27 }
  0x78   :  { %388 = vmatprep.subr.bf16.mxu1 %v736_v28 }
  0x7b   :  { %389 = vmatpush1.bf16.msra.mxu1 %v738_v29 }
  0x7c   :  { %390 = vmatprep.subr.bf16.mxu1 %v739_v30 }
  0x7f   :  { %391 = vmatpush1.bf16.msra.mxu1 %v741_v31 }
  0x80   :  { %392 = vmatprep.subr.bf16.mxu1 %v742_v32  ;;  %v643_v32 = vld [vmem:[%s1000_s6] ss:$0 sm:$0xff] }
  0x83   :  { %393 = vmatpush1.bf16.msra.mxu1 %v744_v33 }
  0x84   :  { %394 = vmatprep.subr.bf16.mxu1 %v745_v34 }
  0x87   :  { %395 = vmatpush1.bf16.msra.mxu1 %v747_v35 }
  0x88   :  { %396 = vmatprep.subr.bf16.mxu1 %v748_v36 }
  0x8b   :  { %397 = vmatpush1.bf16.msra.mxu1 %v750_v37 }
 0x123   :  { %v147_v56 = vpop.f32.mrb[0].mxu0 }
 0x124   :  { %v148_v57 = vadd.f32 %v147_v56, %v92_v54  ;;  %v149_v58 = vpop.f32.mrb[1].mxu0 }
 0x125   :  { %v150_v59 = vadd.f32 %v149_v58, %v96_v55  ;;  %v151_v60 = vpop.f32.mrb[2].mxu0 }
 0x126   :  { %v152_v61 = vadd.f32 %v151_v60, %v92_v54  ;;  %v153_v62 = vpop.f32.mrb[3].mxu0  ;;  %v156_v0 = vmax.f32 %v148_v57, 0.0 }
 0x127   :  { %v154_v63 = vadd.f32 %v153_v62, %v96_v55  ;;  %v157_v2 = vmax.f32 %v150_v59, 0.0 }
 0x128   :  { %v158_v1 = vmax.f32 %v152_v61, 0.0 }
 0x129   :  { %v159_v3 = vmax.f32 %v154_v63, 0.0 }
 0x12a   :  { %v160_v4 = vpack.c.bf16 %v158_v1, %v156_v0 }
 0x12b   :  { %v161_v5 = vpack.c.bf16 %v159_v3, %v157_v2 }
 0x12d   :  { %398 = vmatprep.mubr.bf16.mxu1 %v161_v5 }
 0x12e   :  { %399 = vmatmul.mubr.bf16.vlgmr.msra.gmra.mrb[0].mxu1 %v160_v4 }
 0x201   :  { %v400_v14 = vpop.f32.mrb[0].mxu1 }
 0x202   :  { %v401_v15 = vadd.f32 %v400_v14, %v199_v12  ;;  %v402_v16 = vpop.f32.mrb[1].mxu1 }
 0x203   :  { %v403_v17 = vadd.f32 %v402_v16, %v203_v13  ;;  %v404_v18 = vpop.f32.mrb[2].mxu1 }
 0x204   :  { %v405_v19 = vadd.f32 %v404_v18, %v199_v12  ;;  %v406_v20 = vpop.f32.mrb[3].mxu1  ;;  %v409_v22 = vmax.f32 %v401_v15, 0.0 }
 0x205   :  { %v407_v21 = vadd.f32 %v406_v20, %v203_v13  ;;  %v410_v24 = vmax.f32 %v403_v17, 0.0 }
 0x206   :  { %v411_v23 = vmax.f32 %v405_v19, 0.0 }
 0x207   :  { %v412_v25 = vmax.f32 %v407_v21, 0.0 }
 0x208   :  { %v413_v26 = vpack.c.bf16 %v411_v23, %v409_v22 }
 0x209   :  { %v414_v27 = vpack.c.bf16 %v412_v25, %v410_v24 }
 0x20b   :  { %582 = vmatprep.mubr.bf16.mxu0 %v414_v27 }
 0x20c   :  { %583 = vmatmul.mubr.bf16.vlgmr.msra.gmra.mrb[4].mxu0 %v413_v26 }
 0x2df   :  { %v685_v28 = vpop.f32.mrb[4].mxu0 }
 0x2e0   :  { %v686_v29 = vpop.f32.mrb[5].mxu0 }
 0x2e1   :  { %v687_v30 = vadd.f32 %v686_v29, %v685_v28  ;;  %v688_v31 = vpop.f32.mrb[6].mxu0 }
 0x2e2   :  { %v689_v33 = vpop.f32.mrb[7].mxu0 }
 0x2e3   :  { %v690_v34 = vadd.f32 %v689_v33, %v688_v31  ;;  %v585_v35 = vadd.f32 %v687_v30, %v643_v32 }
 0x2e5   :  { %v588_v36 = vadd.f32 %v690_v34, %v643_v32 }
 0x2e7   :  { %v667_v37 = vpack.c.bf16 %v588_v36, %v585_v35 }
 0x2e9   :  { %668 = vst [vmem:[%s1001_s7] sm:$0xff] %v667_v37  }
 0x2ea   :  { %605 = vsyncpa [#allocation3], 1 }
 0x2eb   :  { %606 = vsyncpa [#allocation5], 1 }
 0x2ec   :  { %607 = vsyncpa [#allocation8], 1 }

</bundles_post_ra>
